<compile_context>
chip_gen: v7x
topology: tpu7x:2x2x1
jax: 0.10.0
libtpu: 0.0.40
codegen_flags: <defaults>
</compile_context>

<pallas_src>
import functools

import jax
import jax.numpy as jnp
from jax.experimental import pallas as pl
from jax.experimental.pallas import tpu as pltpu

GRID_SIZE = 5
STATE_SIZE = GRID_SIZE * GRID_SIZE   # 25
ACTION_SIZE = 4
H1, H2, H3 = 128, 128, 64

# Padded (lane/sublane-aligned) sizes used inside the kernel.
STATE_PAD = 32    # 25 -> 32  : aligned K for the first matmul / rectangular x DMA
H3_PAD = 128      # 64 -> 128 : full lane width for layer-3 act & layer-4 K
OUT_PAD = 128     # 4  -> 128 : lane-dense output slab -> unmasked full-lane stores


def _round_up(n, m):
    return ((n + m - 1) // m) * m


def _cdiv(a, b):
    return -(-a // b)


def _pad2d(a, shape, dtype=None):
    """Zero-pad a 2D array up to `shape`, optionally casting."""
    out = jnp.pad(a, [(0, s - d) for d, s in zip(a.shape, shape)])
    return out.astype(dtype) if dtype is not None else out


def dqn_kernel(x_ref, w1_ref, w234_ref, b_ref, o_ref):
    """x_ref: (TB, 32) f32 batch tile.
    w1_ref: (32, 128) bf16.  w234_ref: (128, 384) bf16 = [W2 | W3 | W4].
    b_ref:  (1, 512) f32     = [b1 | b2 | b3 | b4] (each padded to 128 lanes).
    o_ref:  (TB, 128) bf16 output slab (only the first 4 lanes are real Q-values).
    """
    # bf16 cast of the streamed f32 input happens here (idle VPU), not in a
    # separate XLA pass in the wrapper.
    x = x_ref[...].astype(jnp.bfloat16)

    # Layer 1: (TB, 32) @ (32, 128) + b1 -> ReLU    (rows 25..31 of W1 are zero pad)
    h = jnp.dot(x, w1_ref[...], preferred_element_type=jnp.float32)
    h = jnp.maximum(h + b_ref[:, 0:128], 0.0)
    # Dropout(0.2): identity in eval mode.
    # TODO(synk): training-mode dropout mask not implemented.

    # Layer 2: (TB, 128) @ (128, 128) + b2 -> ReLU
    h = jnp.dot(h.astype(jnp.bfloat16), w234_ref[:, 0:128],
                preferred_element_type=jnp.float32)
    h = jnp.maximum(h + b_ref[:, 128:256], 0.0)
    # Dropout(0.2): identity in eval mode.

    # Layer 3: (TB, 128) @ (128, 128) + b3 -> ReLU
    # (columns 64..127 of W3 / b3 are zero pad -> padded activations are exactly 0)
    h = jnp.dot(h.astype(jnp.bfloat16), w234_ref[:, 128:256],
                preferred_element_type=jnp.float32)
    h = jnp.maximum(h + b_ref[:, 256:384], 0.0)

    # Layer 4 (head): (TB, 128) @ (128, 128) + b4
    # (only rows :64 and columns :4 of W4 are non-zero; output stays lane-dense)
    q = jnp.dot(h.astype(jnp.bfloat16), w234_ref[:, 256:384],
                preferred_element_type=jnp.float32)
    o_ref[...] = (q + b_ref[:, 384:512]).astype(o_ref.dtype)


def prepare_params(params):
    """Pad PyTorch-equivalent (in,out)/(1,out) params to aligned shapes and pack.

    Returns (w1, w234, biases):
      w1     (32, 128)  bf16
      w234   (128, 384) bf16  = [W2 | W3_pad | W4_pad]
      biases (1, 512)   f32   = [b1 | b2 | b3_pad | b4_pad]
    """
    (w1, b1), (w2, b2), (w3, b3), (w4, b4) = params
    w1p = _pad2d(w1, (STATE_PAD, H1), jnp.bfloat16)
    w234 = jnp.concatenate([
        _pad2d(w2, (H1, H2), jnp.bfloat16),
        _pad2d(w3, (H2, H3_PAD), jnp.bfloat16),
        _pad2d(w4, (H3_PAD, OUT_PAD), jnp.bfloat16),
    ], axis=1)
    biases = jnp.concatenate([
        _pad2d(b1, (1, H1), jnp.float32),
        _pad2d(b2, (1, H2), jnp.float32),
        _pad2d(b3, (1, H3_PAD), jnp.float32),
        _pad2d(b4, (1, OUT_PAD), jnp.float32),
    ], axis=1)
    return w1p, w234, biases


def _pick_tile(batch, block_b):
    """Batch tile: multiple of 16, capped by block_b, with a >=2-step grid for
    mid/large batches so the two v7x TensorCores both get work."""
    bp16 = _round_up(batch, 16)
    tb = min(block_b, bp16)
    if bp16 >= 256 and tb >= bp16:      # would collapse to grid=(1,) -> split in two
        tb = _round_up(_cdiv(bp16, 2), 16)
    return tb


@functools.partial(jax.jit, static_argnames=("block_b",))
def dqn_forward(x, padded_params, block_b=512):
    """x: (B, STATE_SIZE) f32 -> (B, ACTION_SIZE) f32.

    block_b: batch tile (sweep 512-1024 for large replay batches). Per-tile
    VMEM is tiny (weights ~100 KB bf16, x tile 64 KB, out tile 128 KB at
    tb=512, double-buffered), so tile size is driven purely by per-step
    overhead amortization / MXU height, never by VMEM capacity.
    """
    w1, w234, biases = padded_params
    B = x.shape[0]
    tb = _pick_tile(B, block_b)
    bp = _round_up(B, tb)
    # Row/column zero-pad only (stays f32; the bf16 cast happens inside the
    # kernel). For B % tb == 0 and pre-padded states this is a no-op.
    xp = _pad2d(x, (bp, STATE_PAD))

    def batch_spec(cols):
        # Streams one batch tile per grid step (auto double-buffered).
        return pl.BlockSpec((tb, cols), lambda i: (i, 0))

    def resident_spec(shape):
        # Constant block index across the batch grid -> tile stays VMEM-resident,
        # Pallas skips the re-DMA after the first step.
        return pl.BlockSpec(shape, lambda i: (0, 0))

    out = pl.pallas_call(
        dqn_kernel,
        out_shape=jax.ShapeDtypeStruct((bp, OUT_PAD), jnp.bfloat16),
        grid_spec=pltpu.PrefetchScalarGridSpec(
            num_scalar_prefetch=0,
            grid=(bp // tb,),
            in_specs=[batch_spec(STATE_PAD),
                      resident_spec(w1.shape),
                      resident_spec(w234.shape),
                      resident_spec(biases.shape)],
            out_specs=pl.BlockSpec((tb, OUT_PAD), lambda i: (i, 0)),
        ),
        compiler_params=pltpu.CompilerParams(
            dimension_semantics=("parallel",)),   # megacore sharding on v7x
    )(xp, w1, w234, biases)
    return out[:B, :ACTION_SIZE].astype(jnp.float32)


def ref_forward(x, padded_params):
    """Pure-JAX reference with the identical bf16/f32 numerics."""
    w1, w234, biases = padded_params
    xp = _pad2d(x, (x.shape[0], STATE_PAD)).astype(jnp.bfloat16)
    h = jnp.maximum(jnp.dot(xp, w1, preferred_element_type=jnp.float32)
                    + biases[:, 0:128], 0.0)
    h = jnp.maximum(jnp.dot(h.astype(jnp.bfloat16), w234[:, 0:128],
                            preferred_element_type=jnp.float32)
                    + biases[:, 128:256], 0.0)
    h = jnp.maximum(jnp.dot(h.astype(jnp.bfloat16), w234[:, 128:256],
                            preferred_element_type=jnp.float32)
                    + biases[:, 256:384], 0.0)
    q = jnp.dot(h.astype(jnp.bfloat16), w234[:, 256:384],
                preferred_element_type=jnp.float32) + biases[:, 384:512]
    q = q.astype(jnp.bfloat16).astype(jnp.float32)   # match kernel's bf16 store
    return q[:, :ACTION_SIZE]


def init_linear(key, fan_in, fan_out):
    """Deterministic init mimicking nn.Linear default (uniform +/- 1/sqrt(fan_in)).

    Weight stored as (fan_in, fan_out) so the kernel computes x @ W directly
    (equivalent to PyTorch's y = x @ W.T + b with its (out, in) weight).
    Bias stored as (1, fan_out) to stay 2D for TPU layouts.
    """
    kw, kb = jax.random.split(key)
    bound = 1.0 / jnp.sqrt(float(fan_in))
    w = jax.random.uniform(kw, (fan_in, fan_out), jnp.float32, -bound, bound)
    b = jax.random.uniform(kb, (1, fan_out), jnp.float32, -bound, bound)
    return w, b


if __name__ == "__main__":
    key = jax.random.PRNGKey(0)
    k_x, k1, k2, k3, k4 = jax.random.split(key, 5)

    B = 8  # small batch for the demo; the grid tiles any batch size
    x = jax.random.normal(k_x, (B, STATE_SIZE), jnp.float32)

    params = (
        init_linear(k1, STATE_SIZE, H1),
        init_linear(k2, H1, H2),
        init_linear(k3, H2, H3),
        init_linear(k4, H3, ACTION_SIZE),
    )
    padded_params = prepare_params(params)

    out = dqn_forward(x, padded_params)
    out = jax.block_until_ready(out)

    expected = ref_forward(x, padded_params)
    assert out.shape == (B, ACTION_SIZE)
    max_err = float(jnp.max(jnp.abs(out - expected)))
    assert jnp.allclose(out, expected, atol=1e-2, rtol=1e-2), max_err

    print("KERNEL_OK")
</pallas_src>

<mosaic_0001>
module attributes {stable_mosaic.version = 11 : i64} {
  func.func @dqn_kernel(%arg0: i32, %arg1: memref<16x32xf32, #tpu.memory_space<vmem>>, %arg2: memref<32x128xbf16, #tpu.memory_space<vmem>>, %arg3: memref<128x384xbf16, #tpu.memory_space<vmem>>, %arg4: memref<1x512xf32, #tpu.memory_space<vmem>>, %arg5: memref<16x128xbf16, #tpu.memory_space<vmem>>) attributes {dimension_semantics = [#tpu.dimension_semantics<parallel>], iteration_bounds = array<i64: 1>, scalar_prefetch = 0 : i64, scratch_operands = 0 : i64, tpu.core_type = #tpu.core_type<tc>, window_params = [{transform_indices = @transform_0, window_bounds = array<i64: 16, 32>}, {pipeline_mode = #tpu.pipeline_mode<synchronous>, transform_indices = @transform_1, window_bounds = array<i64: 32, 128>}, {pipeline_mode = #tpu.pipeline_mode<synchronous>, transform_indices = @transform_2, window_bounds = array<i64: 128, 384>}, {pipeline_mode = #tpu.pipeline_mode<synchronous>, transform_indices = @transform_3, window_bounds = array<i64: 1, 512>}, {transform_indices = @transform_4, window_bounds = array<i64: 16, 128>}]} {
    %c0 = arith.constant 0 : index
    %c0_0 = arith.constant 0 : index
    %0 = vector.load %arg1[%c0, %c0_0] : memref<16x32xf32, #tpu.memory_space<vmem>>, vector<16x32xf32>
    %1 = arith.truncf %0 : vector<16x32xf32> to vector<16x32xbf16>
    %c0_1 = arith.constant 0 : index
    %c0_2 = arith.constant 0 : index
    %2 = vector.load %arg2[%c0_1, %c0_2] : memref<32x128xbf16, #tpu.memory_space<vmem>>, vector<32x128xbf16>
    %cst = arith.constant dense<0.000000e+00> : vector<16x128xf32>
    %3 = tpu.matmul %1, %2, %cst {dimension_numbers = #tpu.dot_dimension_numbers<[1], [0], [0], [1], [0, 0, 1, 1], [], []>} : vector<16x32xbf16>, vector<32x128xbf16>, vector<16x128xf32> -> vector<16x128xf32>
    %c0_3 = arith.constant 0 : index
    %c0_4 = arith.constant 0 : index
    %4 = vector.load %arg4[%c0_3, %c0_4] : memref<1x512xf32, #tpu.memory_space<vmem>>, vector<1x128xf32>
    %5 = vector.broadcast %4 : vector<1x128xf32> to vector<16x128xf32>
    %6 = arith.addf %3, %5 : vector<16x128xf32>
    %cst_5 = arith.constant 0.000000e+00 : f32
    %7 = vector.broadcast %cst_5 : f32 to vector<16x128xf32>
    %8 = arith.maximumf %6, %7 : vector<16x128xf32>
    %9 = arith.truncf %8 : vector<16x128xf32> to vector<16x128xbf16>
    %c0_6 = arith.constant 0 : index
    %c0_7 = arith.constant 0 : index
    %10 = vector.load %arg3[%c0_6, %c0_7] : memref<128x384xbf16, #tpu.memory_space<vmem>>, vector<128x128xbf16>
    %cst_8 = arith.constant dense<0.000000e+00> : vector<16x128xf32>
    %11 = tpu.matmul %9, %10, %cst_8 {dimension_numbers = #tpu.dot_dimension_numbers<[1], [0], [0], [1], [0, 0, 1, 1], [], []>} : vector<16x128xbf16>, vector<128x128xbf16>, vector<16x128xf32> -> vector<16x128xf32>
    %c0_9 = arith.constant 0 : index
    %c128 = arith.constant 128 : index
    %12 = vector.load %arg4[%c0_9, %c128] : memref<1x512xf32, #tpu.memory_space<vmem>>, vector<1x128xf32>
    %13 = vector.broadcast %12 : vector<1x128xf32> to vector<16x128xf32>
    %14 = arith.addf %11, %13 : vector<16x128xf32>
    %cst_10 = arith.constant 0.000000e+00 : f32
    %15 = vector.broadcast %cst_10 : f32 to vector<16x128xf32>
    %16 = arith.maximumf %14, %15 : vector<16x128xf32>
    %17 = arith.truncf %16 : vector<16x128xf32> to vector<16x128xbf16>
    %c0_11 = arith.constant 0 : index
    %c128_12 = arith.constant 128 : index
    %18 = vector.load %arg3[%c0_11, %c128_12] : memref<128x384xbf16, #tpu.memory_space<vmem>>, vector<128x128xbf16>
    %cst_13 = arith.constant dense<0.000000e+00> : vector<16x128xf32>
    %19 = tpu.matmul %17, %18, %cst_13 {dimension_numbers = #tpu.dot_dimension_numbers<[1], [0], [0], [1], [0, 0, 1, 1], [], []>} : vector<16x128xbf16>, vector<128x128xbf16>, vector<16x128xf32> -> vector<16x128xf32>
    %c0_14 = arith.constant 0 : index
    %c256 = arith.constant 256 : index
    %20 = vector.load %arg4[%c0_14, %c256] : memref<1x512xf32, #tpu.memory_space<vmem>>, vector<1x128xf32>
    %21 = vector.broadcast %20 : vector<1x128xf32> to vector<16x128xf32>
    %22 = arith.addf %19, %21 : vector<16x128xf32>
    %cst_15 = arith.constant 0.000000e+00 : f32
    %23 = vector.broadcast %cst_15 : f32 to vector<16x128xf32>
    %24 = arith.maximumf %22, %23 : vector<16x128xf32>
    %25 = arith.truncf %24 : vector<16x128xf32> to vector<16x128xbf16>
    %c0_16 = arith.constant 0 : index
    %c256_17 = arith.constant 256 : index
    %26 = vector.load %arg3[%c0_16, %c256_17] : memref<128x384xbf16, #tpu.memory_space<vmem>>, vector<128x128xbf16>
    %cst_18 = arith.constant dense<0.000000e+00> : vector<16x128xf32>
    %27 = tpu.matmul %25, %26, %cst_18 {dimension_numbers = #tpu.dot_dimension_numbers<[1], [0], [0], [1], [0, 0, 1, 1], [], []>} : vector<16x128xbf16>, vector<128x128xbf16>, vector<16x128xf32> -> vector<16x128xf32>
    %c0_19 = arith.constant 0 : index
    %c384 = arith.constant 384 : index
    %28 = vector.load %arg4[%c0_19, %c384] : memref<1x512xf32, #tpu.memory_space<vmem>>, vector<1x128xf32>
    %29 = vector.broadcast %28 : vector<1x128xf32> to vector<16x128xf32>
    %30 = arith.addf %27, %29 : vector<16x128xf32>
    %31 = arith.truncf %30 : vector<16x128xf32> to vector<16x128xbf16>
    %c0_20 = arith.constant 0 : index
    %c0_21 = arith.constant 0 : index
    %32 = vector.load %arg5[%c0_20, %c0_21] : memref<16x128xbf16, #tpu.memory_space<vmem>>, vector<16x128xbf16>
    tpu.vector_store %arg5[%c0_20, %c0_21], %31 {strides = array<i32>} : memref<16x128xbf16, #tpu.memory_space<vmem>>, vector<16x128xbf16>,
    return
  }
  func.func @transform_0(%arg0: i32) -> (i32, i32) {
    %c0_i32 = arith.constant 0 : i32
    %c0_i32_0 = arith.constant 0 : i32
    return %arg0, %c0_i32 : i32, i32
  }
  func.func @transform_1(%arg0: i32) -> (i32, i32) {
    %c0_i32 = arith.constant 0 : i32
    %c0_i32_0 = arith.constant 0 : i32
    %c0_i32_1 = arith.constant 0 : i32
    return %c0_i32, %c0_i32_0 : i32, i32
  }
  func.func @transform_2(%arg0: i32) -> (i32, i32) {
    %c0_i32 = arith.constant 0 : i32
    %c0_i32_0 = arith.constant 0 : i32
    %c0_i32_1 = arith.constant 0 : i32
    return %c0_i32, %c0_i32_0 : i32, i32
  }
  func.func @transform_3(%arg0: i32) -> (i32, i32) {
    %c0_i32 = arith.constant 0 : i32
    %c0_i32_0 = arith.constant 0 : i32
    %c0_i32_1 = arith.constant 0 : i32
    return %c0_i32, %c0_i32_0 : i32, i32
  }
  func.func @transform_4(%arg0: i32) -> (i32, i32) {
    %c0_i32 = arith.constant 0 : i32
    %c0_i32_0 = arith.constant 0 : i32
    return %arg0, %c0_i32 : i32, i32
  }
}

</mosaic_0001>

<bundles_post_ra>
// kernel: dqn_forward.1
= control target key start
LH: loop header
LB: loop body
LE: loop exit
PB: predicated region body
PF: predicated region fallthrough
CT: control target
= control target key end

     0   :  { %9 = vsyncpa [#allocation3], 0  ;;  %s656_s15 = smov [#allocation2]   ;;  %s759_s0 = inlined_call_operand.vmem [shape: f32[16,32], index: 0, kind: input, shape index: {}]   ;;  %s760_s1 = inlined_call_operand.vmem [shape: bf16[32,128], index: 1, kind: input, shape index: {}]   ;;  %s761_s2 = inlined_call_operand.hbm [shape: bf16[128,384], index: 2, kind: input, shape index: {}]   ;;  %s762_s3 = inlined_call_operand.vmem [shape: f32[1,512], index: 3, kind: input, shape index: {}]   ;;  %s763_s4 = inlined_call_operand.vmem [shape: bf16[16,128], index: 4, kind: output, shape index: {}]  }
   0x1   :  { %s19_s16 = sshll.u32 %s656_s15, 4  ;;  %s632_s19 = scalar_lea.hbm %s761_s2, 3072  ;;  %s20_s16 = int_to_ptr.vmem [resolvable:$true] %s19_s16 }
   0x2   :  { %p633_p0 = scmp.ne.s32.totalorder %s761_s2, %s632_s19  ;;  %p636_p1 = scmp.lt.u32.totalorder %s632_s19, %s761_s2 }
   0x4   :  { %p638_p2 = pnand %p636_p1, %p633_p0 }
   0x6   :  { %641 = shalt.err (!%p638_p2)
}
   0x7   :  { %s642_s24 = scalar_lea.vmem %s20_s16, 3072  ;;  %p647_p4 = scmp.lt.s32.totalorder %s20_s16, %s20_s16 }
   0x8   :  { %p643_p3 = scmp.ne.s32.totalorder %s20_s16, %s642_s24  ;;  %p648_p5 = scmp.lt.s32.totalorder %s642_s24, %s642_s24 }
   0xa   :  { %p649_p6 = por %p648_p5, %p647_p4 }
   0xc   :  { %p650_p7 = pnand %p649_p6, %p643_p3 }
   0xe   :  { %653 = shalt.err (!%p650_p7)
}
   0xf   :  { %s657_s25 = smov 192   ;;  %s658_s26 = smov 12  }
  0x10   :  { %25 = dma.hbm_to_vmem [thread:$0]  %s761_s2, 3072, %s20_s16, [#allocation3], %s657_s25, %s657_s25, %s658_s26  }
  0x11   :  { %654 = dma.done.wait [#allocation3], 3072  }
  0x12   :  { %655 = vsyncadd [#allocation3], 4294964224  ;;  %v659_v0 = vmov 0.0   ;;  %vm660_vm0 = vmmov 0   ;;  %v606_v1 = vld [vmem:[%s760_s1] sm:$0xff]   ;;  %v607_v2 = vld [vmem:[%s760_s1 + $0x8] sm:$0xff]  }
  0x13   :  { %533 = vmatprep.subr.bf16.mxu0 %v659_v0  ;;  %537 = vmatprep.mubr.msk.bf16.mxu0 %vm660_vm0, %v659_v0  ;;  %v32_v3 = vld [vmem:[%s759_s0] sm:$0xff]  ;;  %v33_v4 = vld [vmem:[%s759_s0 + $0x8] sm:$0xff]  ;;  %v608_v5 = vld [vmem:[#allocation2] ss:$12 sps:$4 sm:$0xff]   ;;  %vm58_vm1 = vcmask 261120  }
  0x14   :  { %541 = vmatprep.subr.bf16.mxu1 %v659_v0  ;;  %557 = vmatprep.mubr.msk.bf16.mxu1 %vm660_vm0, %v659_v0  ;;  %v34_v6 = vpack.c.bf16 %v33_v4, %v32_v3  ;;  %v609_v7 = vld [vmem:[#allocation2 + $0x18] ss:$12 sps:$4 sm:$0xff]   ;;  %v610_v8 = vld [vmem:[#allocation2 + $0x30] ss:$12 sps:$4 sm:$0xff]   ;;  %v611_v9 = vld [vmem:[#allocation2 + $0x48] ss:$12 sps:$4 sm:$0xff]  }
  0x15   :  { %534 = vmatpush3.bf16.msra.mxu0 %v606_v1  ;;  %542 = vmatpush3.bf16.msra.mxu1 %v608_v5  ;;  %v612_v10 = vld [vmem:[#allocation2 + $0x60] ss:$12 sps:$4 sm:$0xff]   ;;  %v613_v11 = vld [vmem:[#allocation2 + $0x78] ss:$12 sps:$4 sm:$0xff]   ;;  %v614_v12 = vld [vmem:[#allocation2 + $0x90] ss:$12 sps:$4 sm:$0xff]  }
  0x16   :  { %535 = vmatprep.subr.bf16.mxu0 %v659_v0  ;;  %543 = vmatprep.subr.bf16.mxu1 %v659_v0  ;;  %v615_v13 = vld [vmem:[#allocation2 + $0xa8] ss:$12 sps:$4 sm:$0xff]   ;;  %v616_v14 = vld [vmem:[#allocation2 + $0x4] ss:$12 sps:$4 sm:$0xff]   ;;  %v619_v17 = vld [vmem:[#allocation2 + $0x4c] ss:$12 sps:$4 sm:$0xff]  }
  0x17   :  { %v617_v15 = vld [vmem:[#allocation2 + $0x1c] ss:$12 sps:$4 sm:$0xff]   ;;  %v618_v16 = vld [vmem:[#allocation2 + $0x34] ss:$12 sps:$4 sm:$0xff]   ;;  %v620_v18 = vld [vmem:[#allocation2 + $0x64] ss:$12 sps:$4 sm:$0xff]  }
  0x18   :  { %v621_v19 = vld [vmem:[#allocation2 + $0x7c] ss:$12 sps:$4 sm:$0xff]   ;;  %v463_v20 = vld [vmem:[%s762_s3] ss:$0 sm:$0xff]  ;;  %v622_v30 = vld [vmem:[#allocation2 + $0x94] ss:$12 sps:$4 sm:$0xff]  }
  0x19   :  { %536 = vmatpush3.bf16.msra.mxu0 %v607_v2  ;;  %544 = vmatpush3.bf16.msra.mxu1 %v609_v7  ;;  %v623_v31 = vld [vmem:[#allocation2 + $0xac] ss:$12 sps:$4 sm:$0xff]   ;;  %v624_v32 = vld [vmem:[#allocation2 + $0x8] ss:$12 sps:$4 sm:$0xff]   ;;  %v627_v35 = vld [vmem:[#allocation2 + $0x50] ss:$12 sps:$4 sm:$0xff]  }
  0x1a   :  { %561 = vmatprep.subr.bf16.mxu0 %v659_v0  ;;  %545 = vmatprep.subr.bf16.mxu1 %v659_v0  ;;  %v625_v33 = vld [vmem:[#allocation2 + $0x20] ss:$12 sps:$4 sm:$0xff]   ;;  %v626_v34 = vld [vmem:[#allocation2 + $0x38] ss:$12 sps:$4 sm:$0xff]   ;;  %v628_v36 = vld [vmem:[#allocation2 + $0x68] ss:$12 sps:$4 sm:$0xff]  }
  0x1b   :  { %v629_v37 = vld [vmem:[#allocation2 + $0x80] ss:$12 sps:$4 sm:$0xff]   ;;  %v467_v38 = vld [vmem:[%s762_s3 + $0x1] ss:$0 sm:$0xff]  ;;  %v630_v48 = vld [vmem:[#allocation2 + $0x98] ss:$12 sps:$4 sm:$0xff]  }
  0x1c   :  { %538 = vmatmul.mubr.msk.bf16.vlgmr.msra.gmra.mrb[0].mxu0 %vm58_vm1, %v34_v6  ;;  %v631_v49 = vld [vmem:[#allocation2 + $0xb0] ss:$12 sps:$4 sm:$0xff]  }
  0x1d   :  { %577 = vmatprep.mubr.msk.bf16.mxu0 %vm660_vm0, %v659_v0  ;;  %546 = vmatpush3.bf16.msra.mxu1 %v610_v8  ;;  %v476_v50 = vld [vmem:[%s762_s3 + $0x2] ss:$0 sm:$0xff]  ;;  %v485_v60 = vld [vmem:[%s762_s3 + $0x3] ss:$0 sm:$0xff] }
  0x1e   :  { %547 = vmatprep.subr.bf16.mxu1 %v659_v0  ;;  %562 = vmatpush3.bf16.msra.mxu0 %v616_v14 }
  0x1f   :  { %563 = vmatprep.subr.bf16.mxu0 %v659_v0 }
  0x21   :  { %548 = vmatpush3.bf16.msra.mxu1 %v611_v9 }
  0x22   :  { %549 = vmatprep.subr.bf16.mxu1 %v659_v0  ;;  %564 = vmatpush3.bf16.msra.mxu0 %v617_v15 }
  0x23   :  { %565 = vmatprep.subr.bf16.mxu0 %v659_v0 }
  0x25   :  { %550 = vmatpush3.bf16.msra.mxu1 %v612_v10 }
  0x26   :  { %551 = vmatprep.subr.bf16.mxu1 %v659_v0  ;;  %566 = vmatpush3.bf16.msra.mxu0 %v618_v16 }
  0x27   :  { %567 = vmatprep.subr.bf16.mxu0 %v659_v0 }
  0x29   :  { %552 = vmatpush3.bf16.msra.mxu1 %v613_v11 }
  0x2a   :  { %553 = vmatprep.subr.bf16.mxu1 %v659_v0  ;;  %568 = vmatpush3.bf16.msra.mxu0 %v619_v17 }
  0x2b   :  { %569 = vmatprep.subr.bf16.mxu0 %v659_v0 }
  0x2d   :  { %554 = vmatpush3.bf16.msra.mxu1 %v614_v12 }
  0x2e   :  { %555 = vmatprep.subr.bf16.mxu1 %v659_v0  ;;  %570 = vmatpush3.bf16.msra.mxu0 %v620_v18 }
  0x2f   :  { %571 = vmatprep.subr.bf16.mxu0 %v659_v0 }
  0x31   :  { %556 = vmatpush3.bf16.msra.mxu1 %v615_v13 }
  0x32   :  { %581 = vmatprep.subr.bf16.mxu1 %v659_v0  ;;  %572 = vmatpush3.bf16.msra.mxu0 %v621_v19 }
  0x33   :  { %573 = vmatprep.subr.bf16.mxu0 %v659_v0 }
  0x36   :  { %574 = vmatpush3.bf16.msra.mxu0 %v622_v30 }
  0x37   :  { %575 = vmatprep.subr.bf16.mxu0 %v659_v0 }
  0x3a   :  { %576 = vmatpush3.bf16.msra.mxu0 %v623_v31 }
  0xef   :  { %v96_v21 = vpop.f32.mrb[0].mxu0 }
  0xf0   :  { %v97_v22 = vadd.f32 %v463_v20, %v96_v21  ;;  %v539_v23 = vpop.f32.mrb[1].mxu0 }
  0xf1   :  { %v99_v24 = vpop.f32.mrb[2].mxu0 }
  0xf2   :  { %v100_v25 = vadd.f32 %v463_v20, %v99_v24  ;;  %v540_v26 = vpop.f32.mrb[3].mxu0  ;;  %v103_v27 = vmax.f32 %v97_v22, 0.0 }
  0xf4   :  { %v104_v28 = vmax.f32 %v100_v25, 0.0 }
  0xf6   :  { %v105_v29 = vpack.c.bf16 %v104_v28, %v103_v27 }
  0xf8   :  { %558 = vmatmul.mubr.bf16.vlgmr.msra.gmra.mrb[0].mxu1 %v105_v29 }
  0xf9   :  { %597 = vmatprep.mubr.msk.bf16.mxu1 %vm660_vm0, %v659_v0  ;;  %582 = vmatpush3.bf16.msra.mxu1 %v624_v32 }
  0xfa   :  { %583 = vmatprep.subr.bf16.mxu1 %v659_v0 }
  0xfd   :  { %584 = vmatpush3.bf16.msra.mxu1 %v625_v33 }
  0xfe   :  { %585 = vmatprep.subr.bf16.mxu1 %v659_v0 }
 0x101   :  { %586 = vmatpush3.bf16.msra.mxu1 %v626_v34 }
 0x102   :  { %587 = vmatprep.subr.bf16.mxu1 %v659_v0 }
 0x105   :  { %588 = vmatpush3.bf16.msra.mxu1 %v627_v35 }
 0x106   :  { %589 = vmatprep.subr.bf16.mxu1 %v659_v0 }
 0x109   :  { %590 = vmatpush3.bf16.msra.mxu1 %v628_v36 }
 0x10a   :  { %591 = vmatprep.subr.bf16.mxu1 %v659_v0 }
 0x10d   :  { %592 = vmatpush3.bf16.msra.mxu1 %v629_v37 }
 0x10e   :  { %593 = vmatprep.subr.bf16.mxu1 %v659_v0 }
 0x111   :  { %594 = vmatpush3.bf16.msra.mxu1 %v630_v48 }
 0x112   :  { %595 = vmatprep.subr.bf16.mxu1 %v659_v0 }
 0x115   :  { %596 = vmatpush3.bf16.msra.mxu1 %v631_v49 }
 0x1cb   :  { %v211_v39 = vpop.f32.mrb[0].mxu1 }
 0x1cc   :  { %v212_v40 = vadd.f32 %v467_v38, %v211_v39  ;;  %v559_v41 = vpop.f32.mrb[1].mxu1 }
 0x1cd   :  { %v214_v42 = vpop.f32.mrb[2].mxu1 }
 0x1ce   :  { %v215_v43 = vadd.f32 %v467_v38, %v214_v42  ;;  %v560_v44 = vpop.f32.mrb[3].mxu1  ;;  %v218_v45 = vmax.f32 %v212_v40, 0.0 }
 0x1d0   :  { %v219_v46 = vmax.f32 %v215_v43, 0.0 }
 0x1d2   :  { %v220_v47 = vpack.c.bf16 %v219_v46, %v218_v45 }
 0x1d4   :  { %578 = vmatmul.mubr.bf16.vlgmr.msra.gmra.mrb[4].mxu0 %v220_v47 }
 0x2a7   :  { %v326_v51 = vpop.f32.mrb[4].mxu0 }
 0x2a8   :  { %v327_v52 = vadd.f32 %v476_v50, %v326_v51  ;;  %v579_v53 = vpop.f32.mrb[5].mxu0 }
 0x2a9   :  { %v329_v54 = vpop.f32.mrb[6].mxu0 }
 0x2aa   :  { %v330_v55 = vadd.f32 %v476_v50, %v329_v54  ;;  %v580_v56 = vpop.f32.mrb[7].mxu0  ;;  %v333_v57 = vmax.f32 %v327_v52, 0.0 }
 0x2ac   :  { %v334_v58 = vmax.f32 %v330_v55, 0.0 }
 0x2ae   :  { %v335_v59 = vpack.c.bf16 %v334_v58, %v333_v57 }
 0x2b0   :  { %598 = vmatmul.mubr.bf16.vlgmr.msra.gmra.mrb[4].mxu1 %v335_v59 }
 0x383   :  { %v441_v61 = vpop.f32.mrb[4].mxu1 }
 0x384   :  { %v599_v62 = vpop.f32.mrb[5].mxu1  ;;  %v442_v0 = vadd.f32 %v485_v60, %v441_v61 }
 0x385   :  { %v444_v63 = vpop.f32.mrb[6].mxu1 }
 0x386   :  { %v445_v1 = vadd.f32 %v485_v60, %v444_v63  ;;  %v600_v2 = vpop.f32.mrb[7].mxu1 }
 0x388   :  { %v501_v3 = vpack.c.bf16 %v445_v1, %v442_v0 }
 0x38a   :  { %502 = vst [vmem:[%s763_s4] sm:$0xff] %v501_v3  }
 0x38b   :  { %462 = vsyncpa [#allocation3], 1 }

</bundles_post_ra>
